<compile_context>
chip_gen: v6e
topology: v6e:2x2x1
jax: 0.10.0
libtpu: 0.0.40
codegen_flags: <defaults>
</compile_context>

<pallas_src>
import jax
import jax.numpy as jnp
from jax import lax
from jax.experimental import pallas as pl
from jax.experimental.pallas import tpu as pltpu

N_EMBD = 64      # synthetic small n_embd for the demo (module default is 384)
HEAD_SIZE = 32
DROPOUT_P = 0.2  # unused at inference


def _head_kernel(x_ref, wqkv_ref, o_ref):
    BB, T, C = x_ref.shape          # batch-block, sequence, embed
    H = o_ref.shape[-1]

    # ---- Fused K/Q/V projection: one (BB*T, C) @ (C, n_pad) MXU matmul.
    # Inputs arrive already bf16 (cast at the pallas_call boundary); f32 acc.
    x2d = x_ref[...].reshape(BB * T, C)
    proj = jnp.dot(x2d, wqkv_ref[...],
                   preferred_element_type=jnp.float32)              # (BB*T, n_pad) f32

    k = proj[:, 0 * H:1 * H].reshape(BB, T, H)
    q = proj[:, 1 * H:2 * H].reshape(BB, T, H)   # C**-0.5 already folded into weights
    v = proj[:, 2 * H:3 * H].reshape(BB, T, H)

    # Scores: key @ query^T (faithful to the PyTorch module's quirky ordering).
    # einsum contracts the trailing head dims directly -> no XLU transpose of q.
    wei = jnp.einsum('bth,bsh->bts',
                     k.astype(jnp.bfloat16), q.astype(jnp.bfloat16),
                     preferred_element_type=jnp.float32)             # (BB, T, T) f32

    # Causal mask: one (T, T) compare, broadcast over the batch dim.
    row = lax.broadcasted_iota(jnp.int32, (T, T), 0)
    col = lax.broadcasted_iota(jnp.int32, (T, T), 1)
    mask = col <= row                                                # (T, T) bool
    wei = jnp.where(mask[None, :, :], wei, jnp.float32(-1e30))

    # Numerically-stable softmax over the last axis, kept in f32.
    m = jnp.max(wei, axis=-1, keepdims=True)
    e = jnp.exp(wei - m)
    denom = jnp.sum(e, axis=-1, keepdims=True)
    p = e * pl.reciprocal(denom, approx=True)

    # TODO(synk): training-mode dropout (p=0.2) would use pltpu.prng_seed +
    # pltpu.prng_random_bits; eval-mode dropout is the identity, used here.

    out = jnp.einsum('bts,bsh->bth',
                     p.astype(jnp.bfloat16), v.astype(jnp.bfloat16),
                     preferred_element_type=jnp.float32)             # (BB, T, H)
    o_ref[...] = out.astype(o_ref.dtype)


def head_forward(x, wk, wq, wv, *, batch_block=None, vmem_budget_bytes=None):
    """x: (B, T, C) float32; wk/wq/wv: (C, H) float32 (already transposed from
    the PyTorch (H, C) Linear weight layout)."""
    B, T, C = x.shape
    H = wk.shape[1]

    # Fold the C**-0.5 score scale into the q weight columns (weight-side
    # constant, zero per-step cost) and fuse K/Q/V into one (C, 3H) matmul.
    scale = jnp.float32(C) ** jnp.float32(-0.5)
    wqkv = jnp.concatenate([wk, wq * scale, wv], axis=1)              # (C, 3H)

    # Pad the fused projection width up to a lane multiple of 128 so the proj
    # intermediate lives in unmasked vregs; the zero columns are free on the
    # (badly underfilled anyway) MXU pass.
    n = 3 * H
    n_pad = ((n + 127) // 128) * 128
    if n_pad != n:
        wqkv = jnp.pad(wqkv, ((0, 0), (0, n_pad - n)))

    # Cast at the boundary: the HBM->VMEM DMA then moves bf16 bytes (the
    # matmuls already consume bf16, so accuracy is unchanged).
    x_bf16 = x.astype(jnp.bfloat16)
    wqkv_bf16 = wqkv.astype(jnp.bfloat16)

    if batch_block is None:
        # Default to >=2 "parallel" grid steps when B >= 2 so v7x's second
        # TensorCore gets work (no effect on 1-TC v5e/v6e), then clamp the
        # per-step VMEM footprint (f32 scores dominate at real sizes).
        bb = max(1, B // 2) if B >= 2 else max(1, B)

        def _step_bytes(b):
            return (2 * b * T * C * 2          # double-buffered bf16 x tile
                    + b * T * n_pad * 4        # proj (f32)
                    + 3 * b * T * T * 4        # wei / e / p (f32)
                    + 2 * b * T * H * 4)       # double-buffered f32 output tile

        budget = vmem_budget_bytes if vmem_budget_bytes is not None else (16 << 20)
        while bb > 1 and (B % bb != 0 or _step_bytes(bb) > budget):
            bb -= 1
        batch_block = bb

    assert B % batch_block == 0
    grid = (B // batch_block,)

    return pl.pallas_call(
        _head_kernel,
        out_shape=jax.ShapeDtypeStruct((B, T, H), x.dtype),
        grid_spec=pltpu.PrefetchScalarGridSpec(
            num_scalar_prefetch=0,
            grid=grid,
            in_specs=[
                pl.BlockSpec((batch_block, T, C), lambda b: (b, 0, 0)),
                pl.BlockSpec((C, n_pad), lambda b: (0, 0)),
            ],
            out_specs=pl.BlockSpec((batch_block, T, H), lambda b: (b, 0, 0)),
        ),
        compiler_params=pltpu.CompilerParams(
            dimension_semantics=("parallel",)),
    )(x_bf16, wqkv_bf16)


def _reference(x, wk, wq, wv):
    k = x @ wk
    q = x @ wq
    v = x @ wv
    C = x.shape[-1]
    wei = (k @ jnp.swapaxes(q, -1, -2)) * (C ** -0.5)
    T = x.shape[1]
    mask = jnp.tril(jnp.ones((T, T), dtype=bool))
    wei = jnp.where(mask, wei, -jnp.inf)
    wei = jax.nn.softmax(wei, axis=-1)
    return wei @ v


if __name__ == "__main__":
    key = jax.random.PRNGKey(0)
    kx, kk, kq, kv = jax.random.split(key, 4)

    B, T, C, H = 2, 16, N_EMBD, HEAD_SIZE

    x = jax.random.normal(kx, (B, T, C), dtype=jnp.float32)

    # Deterministic parameter init, PyTorch Linear layout (H, C), then transpose.
    bound = 1.0 / (C ** 0.5)
    wk_t = jax.random.uniform(kk, (H, C), minval=-bound, maxval=bound, dtype=jnp.float32)
    wq_t = jax.random.uniform(kq, (H, C), minval=-bound, maxval=bound, dtype=jnp.float32)
    wv_t = jax.random.uniform(kv, (H, C), minval=-bound, maxval=bound, dtype=jnp.float32)
    wk, wq, wv = wk_t.T, wq_t.T, wv_t.T   # (C, H)

    out = head_forward(x, wk, wq, wv)
    out = jax.block_until_ready(out)

    ref = _reference(x, wk, wq, wv)
    assert out.shape == (B, T, H)
    # bf16 matmul inputs (f32 accumulation) -> tolerance loosened vs the f32 reference.
    assert jnp.allclose(out, ref, atol=3e-2, rtol=3e-2), "mismatch vs JAX reference"

    print("KERNEL_OK")
</pallas_src>

<mosaic_0001>
module attributes {stable_mosaic.version = 11 : i64} {
  func.func @_head_kernel(%arg0: i32, %arg1: memref<1x16x64xbf16, #tpu.memory_space<vmem>>, %arg2: memref<64x128xbf16, #tpu.memory_space<vmem>>, %arg3: memref<1x16x32xf32, #tpu.memory_space<vmem>>) attributes {dimension_semantics = [#tpu.dimension_semantics<parallel>], iteration_bounds = array<i64: 2>, scalar_prefetch = 0 : i64, scratch_operands = 0 : i64, tpu.core_type = #tpu.core_type<tc>, window_params = [{transform_indices = @transform_0, window_bounds = array<i64: 1, 16, 64>}, {pipeline_mode = #tpu.pipeline_mode<synchronous>, transform_indices = @transform_1, window_bounds = array<i64: 64, 128>}, {transform_indices = @transform_2, window_bounds = array<i64: 1, 16, 32>}]} {
    %c0 = arith.constant 0 : index
    %c0_0 = arith.constant 0 : index
    %c0_1 = arith.constant 0 : index
    %0 = vector.load %arg1[%c0, %c0_0, %c0_1] : memref<1x16x64xbf16, #tpu.memory_space<vmem>>, vector<1x16x64xbf16>
    %1 = vector.shape_cast %0 : vector<1x16x64xbf16> to vector<16x64xbf16>
    %c0_2 = arith.constant 0 : index
    %c0_3 = arith.constant 0 : index
    %2 = vector.load %arg2[%c0_2, %c0_3] : memref<64x128xbf16, #tpu.memory_space<vmem>>, vector<64x128xbf16>
    %cst = arith.constant dense<0.000000e+00> : vector<16x128xf32>
    %3 = tpu.matmul %1, %2, %cst {dimension_numbers = #tpu.dot_dimension_numbers<[1], [0], [0], [1], [0, 0, 1, 1], [], []>} : vector<16x64xbf16>, vector<64x128xbf16>, vector<16x128xf32> -> vector<16x128xf32>
    %4 = vector.extract_strided_slice %3 {offsets = [0, 0], sizes = [16, 32], strides = [1, 1]} : vector<16x128xf32> to vector<16x32xf32>
    %5 = vector.shape_cast %4 : vector<16x32xf32> to vector<1x16x32xf32>
    %6 = vector.extract_strided_slice %3 {offsets = [0, 32], sizes = [16, 32], strides = [1, 1]} : vector<16x128xf32> to vector<16x32xf32>
    %7 = vector.shape_cast %6 : vector<16x32xf32> to vector<1x16x32xf32>
    %8 = vector.extract_strided_slice %3 {offsets = [0, 64], sizes = [16, 32], strides = [1, 1]} : vector<16x128xf32> to vector<16x32xf32>
    %9 = vector.shape_cast %8 : vector<16x32xf32> to vector<1x16x32xf32>
    %10 = arith.truncf %5 : vector<1x16x32xf32> to vector<1x16x32xbf16>
    %11 = arith.truncf %7 : vector<1x16x32xf32> to vector<1x16x32xbf16>
    "tpu.trace_start"() <{level = 10 : i32, message = "bth,bsh->bts"}> : () -> ()
    %cst_4 = arith.constant dense<0.000000e+00> : vector<1x16x16xf32>
    %12 = tpu.matmul %10, %11, %cst_4 {dimension_numbers = #tpu.dot_dimension_numbers<[2], [2], [1], [1], [0, 0, 0, 1, 1, 1], [0], [0]>} : vector<1x16x32xbf16>, vector<1x16x32xbf16>, vector<1x16x16xf32> -> vector<1x16x16xf32>
    "tpu.trace_stop"() : () -> ()
    %13 = tpu.iota {dimensions = array<i32: 0>} : vector<16x16xi32>
    %14 = tpu.iota {dimensions = array<i32: 1>} : vector<16x16xi32>
    %15 = arith.cmpi sle, %14, %13 : vector<16x16xi32>
    %16 = vector.shape_cast %15 : vector<16x16xi1> to vector<1x16x16xi1>
    %cst_5 = arith.constant -1.000000e+30 : f32
    %17 = vector.broadcast %cst_5 : f32 to vector<1x16x16xf32>
    %18 = arith.select %16, %12, %17 : vector<1x16x16xi1>, vector<1x16x16xf32>
    %cst_6 = arith.constant dense<0xFF800000> : vector<1x16xf32>
    %19 = vector.multi_reduction <maximumf>, %18, %cst_6 [2] : vector<1x16x16xf32> to vector<1x16xf32>
    %20 = vector.shape_cast %19 : vector<1x16xf32> to vector<1x16x1xf32>
    %21 = vector.broadcast %20 : vector<1x16x1xf32> to vector<1x16x16xf32>
    %22 = arith.subf %18, %21 : vector<1x16x16xf32>
    %23 = math.exp %22 : vector<1x16x16xf32>
    %cst_7 = arith.constant dense<0.000000e+00> : vector<1x16xf32>
    %24 = vector.multi_reduction <add>, %23, %cst_7 [2] : vector<1x16x16xf32> to vector<1x16xf32>
    %25 = vector.shape_cast %24 : vector<1x16xf32> to vector<1x16x1xf32>
    %26 = tpu.reciprocal %25 {approx = true} : vector<1x16x1xf32> -> vector<1x16x1xf32>
    %27 = vector.broadcast %26 : vector<1x16x1xf32> to vector<1x16x16xf32>
    %28 = arith.mulf %23, %27 : vector<1x16x16xf32>
    %29 = arith.truncf %28 : vector<1x16x16xf32> to vector<1x16x16xbf16>
    %30 = arith.truncf %9 : vector<1x16x32xf32> to vector<1x16x32xbf16>
    "tpu.trace_start"() <{level = 10 : i32, message = "bts,bsh->bth"}> : () -> ()
    %cst_8 = arith.constant dense<0.000000e+00> : vector<1x16x32xf32>
    %31 = tpu.matmul %29, %30, %cst_8 {dimension_numbers = #tpu.dot_dimension_numbers<[2], [1], [1], [2], [0, 0, 0, 1, 1, 2], [0], [0]>} : vector<1x16x16xbf16>, vector<1x16x32xbf16>, vector<1x16x32xf32> -> vector<1x16x32xf32>
    "tpu.trace_stop"() : () -> ()
    %c0_9 = arith.constant 0 : index
    %c0_10 = arith.constant 0 : index
    %c0_11 = arith.constant 0 : index
    %32 = vector.load %arg3[%c0_9, %c0_10, %c0_11] : memref<1x16x32xf32, #tpu.memory_space<vmem>>, vector<1x16x32xf32>
    tpu.vector_store %arg3[%c0_9, %c0_10, %c0_11], %31 {strides = array<i32>} : memref<1x16x32xf32, #tpu.memory_space<vmem>>, vector<1x16x32xf32>,
    return
  }
  func.func @transform_0(%arg0: i32) -> (i32, i32, i32) {
    %c0_i32 = arith.constant 0 : i32
    %c0_i32_0 = arith.constant 0 : i32
    %c0_i32_1 = arith.constant 0 : i32
    return %arg0, %c0_i32, %c0_i32_0 : i32, i32, i32
  }
  func.func @transform_1(%arg0: i32) -> (i32, i32) {
    %c0_i32 = arith.constant 0 : i32
    %c0_i32_0 = arith.constant 0 : i32
    %c0_i32_1 = arith.constant 0 : i32
    return %c0_i32, %c0_i32_0 : i32, i32
  }
  func.func @transform_2(%arg0: i32) -> (i32, i32, i32) {
    %c0_i32 = arith.constant 0 : i32
    %c0_i32_0 = arith.constant 0 : i32
    %c0_i32_1 = arith.constant 0 : i32
    return %arg0, %c0_i32, %c0_i32_0 : i32, i32, i32
  }
}

</mosaic_0001>

<bundles_post_ra>
// kernel: tpu_custom_call.1
= control target key start
LH: loop header
LB: loop body
LE: loop exit
PB: predicated region body
PF: predicated region fallthrough
CT: control target
= control target key end

     0   :  { %7 = vsyncpa [#allocation3], 0  ;;  %s976_s0 = inlined_call_operand.hbm [shape: bf16[2,16,64], index: 0, kind: input, shape index: {}]   ;;  %s977_s1 = inlined_call_operand.hbm [shape: bf16[64,128], index: 1, kind: input, shape index: {}]   ;;  %s978_s2 = inlined_call_operand.hbm [shape: f32[2,16,32], index: 2, kind: output, shape index: {}]  }
   0x1   :  { %9 = vsyncpa [#allocation3 + $0x1], 0 }
   0x2   :  { %10 = vsyncpa [#allocation6], 0 }
   0x3   :  { %11 = vsyncpa [#allocation4], 0 }
   0x4   :  { %13 = vsyncpa [#allocation4 + $0x1], 0  ;;  %s780_s9 = smov 0   ;;  %s782_s10 = smov 0  }
   0x5   :  { %s784_s11 = smov 0   ;;  %s786_s12 = smov 0  }
   0x6 LB: > { %s801_s13 = sadd.s32 4294967295, %s752_s12   ;;  %s493_s14 = sadd.s32 4294967294, %s752_s12   ;;  %s752_s12 = sphi %s786_s12, %s1000_s12   ;;  %s748_s11 = sphi %s784_s11, %s999_s11   ;;  %s744_s10 = sphi %s782_s10, %s998_s10   ;;  %s740_s9 = sphi %s780_s9, %s997_s9  }
   0x7   : > { %p39_p0 = scmp.ne.s32.totalorder %s744_s10, %s740_s9  ;;  %p979_p1 = scmp.eq.s32.totalorder %s801_s13, 0 }
   0x8   : > { %p90_p3 = scmp.eq.s32.totalorder %s493_s14, 1  ;;  %p494_p5 = scmp.ge.s32.totalorder %s752_s12, 1 }
   0x9   : > { %p810_p4 = por %p979_p1, %p39_p0  ;;  %p97_p7 = scmp.lt.s32.totalorder %s752_s12, 3 }
   0xa   : > { %p815_p6 = por %p90_p3, %p39_p0  ;;  %s754_s18 = smov [#allocation5]  }
   0xb   : > { %s983_s15 = scalar_select %p810_p4, 1, 0 }
   0xc   : > { %s984_s16 = scalar_select %p815_p6, 1, 0 }
   0xd   : > { %p820_p8 = pnand %p494_p5, %p97_p7  ;;  %s109_s19 = sshll.u32 %s754_s18, 4  ;;  %s110_s19 = int_to_ptr.vmem [resolvable:$true] %s109_s19 }
   0xe   : > { %s834_s21 = sadd.s32 1, %s752_s12   ;;  %s26_s22 = sadd.s32 1, %s748_s11 }
   0xf   : > { %s985_s17 = scalar_select %p820_p8, 1, 0 }
  0x10   : > { %p560_p9 = pneg %p820_p8  ;;  %s23_s23 = ssub.s32 %s752_s12, %s834_s21 }
  0x11   : > { %s641_s24 = scalar_lea.vmem %s110_s19, 512  ;;  %p649_p5 = scmp.lt.s32.totalorder %s110_s19, %s110_s19 }
  0x12   : > { %p829_p11 = pnand %p560_p9, %p979_p1  ;;  %p642_p13 = scmp.ne.s32.totalorder %s110_s19, %s641_s24 }
  0x13   : > { %p650_p7 = scmp.lt.s32.totalorder %s641_s24, %s641_s24 }
  0x14   : > { %p632_p12 = pneg %p829_p11 }
  0x15   : > { %p651_p10 = por %p650_p7, %p649_p5 }
  0x16   : > { %p644_p0 = pnand %p642_p13, %p632_p12 }
  0x18   : > { %p645_p3 = pneg %p644_p0 }
  0x1a   : > { %p652_p2 = pnand %p651_p10, %p645_p3 }
  0x1c   : > { %655 = shalt.err (!%p652_p2)
}
  0x1d   : > { %s755_s25 = smov 64   ;;  %s756_s26 = smov 4  }
  0x1e   : > { %563 = dma.hbm_to_vmem [thread:$0]  (!%p829_p11), %s977_s1, 512, %s110_s19, [#allocation6], %s755_s25, %s755_s25, %s756_s26  }
  0x1f   : > { %p24_p2 = scmp.eq.s32.totalorder %s23_s23, 0  ;;  %p33_p9 = scmp.ne.s32.totalorder %s748_s11, %s744_s10 }
  0x20   : > { %p34_p10 = scmp.eq.s32.totalorder %s752_s12, 0  ;;  %p573_p12 = scmp.lt.s32.totalorder %s752_s12, 2 }
  0x21   : > { %s854_s29 = scalar_select %p24_p2, %s748_s11, %s26_s22  }
  0x22   : > { %p35_p13 = por %p34_p10, %p33_p9  ;;  %p987_p0 = scmp.eq.s32.totalorder %s801_s13, 1 }
  0x23   : > { %s123_s3 = sand.u32 1, %s748_s11   ;;  %s517_s4 = sshll.u32 %s752_s12, 7 }
  0x24   : > { %p858_p3 = por %p987_p0, %p33_p9  ;;  %s497_s5 = sshll.u32 %s123_s3, 3 }
  0x25   : > { %s867_s8 = scalar_lea.hbm %s976_s0, %s517_s4  ;;  %s127_s14 = scalar_lea.vmem [#allocation2], %s497_s5 }
  0x26   : > { %s988_s30 = scalar_select %p858_p3, 1, 0 }
  0x27   : > { %s134_s18 = sshll.u32 %s127_s14, 4  ;;  %p869_p11 = pnand %p573_p12, %p35_p13  ;;  %s873_s18 = int_to_ptr.vmem [resolvable:$true] %s134_s18 }
  0x28   : > { %s875_s20 = scalar_lea.sflag [#allocation3], %s123_s3  ;;  %s656_s22 = scalar_lea.hbm %s867_s8, 128 }
  0x29   : > { %p657_p5 = scmp.ne.s32.totalorder %s867_s8, %s656_s22  ;;  %p658_p7 = pneg %p869_p11 }
  0x2a   : > { %s661_s27 = scalar_lea.hbm %s976_s0, 256  ;;  %p662_p10 = scmp.lt.s32.totalorder %s867_s8, %s976_s0 }
  0x2b   : > { %p659_p2 = pnand %p658_p7, %p657_p5  ;;  %p663_p12 = scmp.lt.s32.totalorder %s661_s27, %s656_s22 }
  0x2d   : > { %p660_p9 = pneg %p659_p2  ;;  %p664_p13 = por %p663_p12, %p662_p10 }
  0x2f   : > { %p665_p0 = pnand %p664_p13, %p660_p9 }
  0x31   : > { %668 = shalt.err (!%p665_p0)
}
  0x32   : > { %s669_s3 = scalar_lea.vmem %s873_s18, 128  ;;  %s757_s5 = smov [#allocation2]  }
  0x33   : > { %p670_p1 = scmp.ne.s32.totalorder %s873_s18, %s669_s3  ;;  %s674_s6 = sshll.u32 %s757_s5, 4  ;;  %s675_s6 = int_to_ptr.vmem [resolvable:$false] %s674_s6 }
  0x34   : > { %s676_s7 = scalar_lea.vmem %s675_s6, 256  ;;  %p677_p2 = scmp.lt.s32.totalorder %s873_s18, %s675_s6 }
  0x35   : > { %p672_p6 = pnand %p670_p1, %p658_p7  ;;  %p678_p3 = scmp.lt.s32.totalorder %s676_s7, %s669_s3 }
  0x37   : > { %p673_p5 = pneg %p672_p6  ;;  %p679_p4 = por %p678_p3, %p677_p2 }
  0x39   : > { %p680_p8 = pnand %p679_p4, %p673_p5 }
  0x3b   : > { %683 = shalt.err (!%p680_p8)
}
  0x3c   : > { %567 = dma.hbm_to_vmem [thread:$0]  (!%p869_p11), %s867_s8, 128, %s873_s18, %s875_s20, %s755_s25, %s755_s25, %s756_s26  }
  0x3d   : > { %p990_p1 = scmp.ne.s32.totalorder %s985_s17, 0 }
  0x3e   : > { %s902_s14 = sand.u32 (!%p990_p1), 1, %s744_s10   ;;  %p991_p4 = scmp.ne.s32.totalorder (!%p990_p1), %s983_s15, 0 }
  0x3f   : > { %146 = sbr.rel (%p990_p1) target bundleno = 1136 (0x470), region = 28  ;;  %s501_s22 = sshll.u32 (!%p990_p1), %s902_s14, 3 }
  0x40   : > { %s149_s23 = scalar_lea.sflag (!%p990_p1), [#allocation3], %s902_s14  ;;  %s152_s24 = scalar_lea.vmem (!%p990_p1), [#allocation2], %s501_s22 }
  0x44   : > { %727 = dma.done.wait (%p991_p4), %s149_s23, 128  }
  0x45   : > { %729 = vsyncadd (%p991_p4), %s149_s23, 4294967168  ;;  %p992_p6 = scmp.eq.s32.totalorder %s801_s13, 0 }
  0x47   : > { %731 = dma.done.wait (%p992_p6), [#allocation6], 512   ;;  %p993_p8 = pmov %p992_p6 }
  0x48   : > { %v758_v0 = vmov 0.0   ;;  %vm759_vm0 = vmmov 0   ;;  %v617_v1 = vld [vmem:[#allocation5 + $0x18] sm:$0xff]   ;;  %v618_v2 = vld [vmem:[#allocation5 + $0x10] sm:$0xff]   ;;  %v619_v3 = vld [vmem:[#allocation5 + $0x8] sm:$0xff]   ;;  %vm217_vm1 = vcmask 523264   ;;  %v314_v13 = vlaneseq }
  0x49   : > { %733 = vsyncadd (%p993_p8), [#allocation6], 4294966784  ;;  %528 = vmatprep.subr.bf16.mxu0 %v758_v0  ;;  %536 = vmatprep.mubr.msk.bf16.mxu0 %vm759_vm0, %v758_v0  ;;  %v620_v4 = vld [vmem:[#allocation5] sm:$0xff]   ;;  %v621_v5 = vld [vmem:[%s152_s24] sm:$0xff]   ;;  %s760_s15 = smov 96   ;;  %vm266_vm2 = vcmask 261120  }
  0x4a   : > { %540 = vmatprep.subr.bf16.mxu1 %v758_v0  ;;  %542 = vmatprep.mubr.msk.bf16.mxu1 %vm759_vm0, %v758_v0  ;;  %v315_v14 = vshrl.u32 %v314_v13, 7  ;;  %v318_v15 = vand.u32 127, %v314_v13  ;;  %vm323_vm4 = vcmask 130048   ;;  %s761_s17 = smov 64   ;;  %s503_s25 = sshll.u32 %s902_s14, 4 }
  0x4b   : > { %529 = vmatpush3.bf16.msra.mxu0 %v617_v1  ;;  %s176_s26 = scalar_lea.vmem [#allocation7], %s503_s25  ;;  %s518_s18 = sshll.u32 %s801_s13, 8 }
  0x4c   : > { %530 = vmatprep.subr.bf16.mxu0 %v758_v0  ;;  %vm319_vm3 = vcmp.le.s32.totalorder %v318_v15, %v315_v14  ;;  %v316_v16 = vadd.s32 8, %v315_v14  ;;  %s410_s8 = sshll.u32 %s176_s26, 4  ;;  %s932_s27 = scalar_lea.hbm %s978_s2, %s518_s18  ;;  %s927_s8 = int_to_ptr.vmem [resolvable:$true] %s410_s8 }
  0x4d   : > { %s397_s28 = scalar_lea.sflag [#allocation4], %s902_s14  ;;  %s684_s13 = scalar_lea.vmem %s927_s8, 256 }
  0x4e   : > { %vm320_vm5 = vcmp.le.s32.totalorder %v318_v15, %v316_v16  ;;  %p685_p3 = scmp.ne.s32.totalorder %s927_s8, %s684_s13  ;;  %p994_p11 = scmp.ne.s32.totalorder %s988_s30, 0 }
  0x4f   : > { %531 = vmatpush3.bf16.msra.mxu0 %v618_v2  ;;  %s762_s4 = smov [#allocation7]  }
  0x50   : > { %532 = vmatprep.subr.bf16.mxu0 %v758_v0  ;;  %p686_p7 = pnand %p685_p3, %p994_p11  ;;  %s688_s3 = sshll.u32 %s762_s4, 4  ;;  %s689_s3 = int_to_ptr.vmem [resolvable:$false] %s688_s3 }
  0x51   : > { %s690_s5 = scalar_lea.vmem %s689_s3, 512  ;;  %p691_p10 = scmp.lt.s32.totalorder %s927_s8, %s689_s3 }
  0x52   : > { %p687_p9 = pneg %p686_p7  ;;  %p692_p12 = scmp.lt.s32.totalorder %s690_s5, %s684_s13 }
  0x53   : > { %533 = vmatpush3.bf16.msra.mxu0 %v619_v3 }
  0x54   : > { %534 = vmatprep.subr.bf16.mxu0 %v758_v0  ;;  %p693_p13 = por %p692_p12, %p691_p10 }
  0x56   : > { %p694_p0 = pnand %p693_p13, %p687_p9 }
  0x57   : > { %535 = vmatpush3.bf16.msra.mxu0 %v620_v4 }
  0x5a   : > { %537 = vmatmul.mubr.msk.bf16.vlgmr.msra.gmra.mxu0 %vm217_vm1, %v621_v5 }
 0x11a   : > { %v255_v6 = vpop.f32.mrf.mxu0 }
 0x11c   : > { %v538_v7 = vpop.f32.mrf.mxu0 }
 0x11e   : > { %v258_v8 = vpop.f32.mrf.mxu0 }
 0x11f   : > { %v262_v9 = vpack.c.bf16 %v258_v8, %v255_v6 }
 0x120   : > { %v539_v10 = vpop.f32.mrf.mxu0 }
 0x121   : > { %264 = vrot.lane.b32.xlu0 %v262_v9, %s760_s15 }
 0x193   : > { %v265_v11 = vpop.permute.xlu0 %264 }
 0x194   : > { %v271_v12 = vsel %vm266_vm2, %v265_v11, 0 }
 0x195   : > { %541 = vmatpush3.bf16.xpose.msra.mxu1 %v271_v12 }
 0x196   : > { %546 = vmatprep.subr.bf16.mxu1 %v758_v0 }
 0x19c   : > { %543 = vmatmul.mubr.msk.bf16.vlgmr.msra.gmra.mxu1 %vm266_vm2, %v262_v9 }
 0x19d   : > { %548 = vmatprep.mubr.msk.bf16.mxu1 %vm759_vm0, %v758_v0 }
 0x25c   : > { %v307_v17 = vpop.f32.mrf.mxu1 }
 0x25d   : > { %v321_v18 = vsel %vm319_vm3, %v307_v17, -1e+30 }
 0x25e   : > { %v544_v19 = vpop.f32.mrf.mxu1  ;;  %v324_v20 = vsel %vm323_vm4, %v321_v18, -inf }
 0x25f   : > { %325 = vmax.xlane.f32.xlu0 %v324_v20 }
 0x260   : > { %v310_v21 = vpop.f32.mrf.mxu1 }
 0x261   : > { %v322_v22 = vsel %vm320_vm5, %v310_v21, -1e+30 }
 0x262   : > { %v545_v23 = vpop.f32.mrf.mxu1  ;;  %v327_v24 = vsel %vm323_vm4, %v322_v22, -inf }
 0x263   : > { %328 = vmax.xlane.f32.xlu1 %v327_v24 }
 0x2e8   : > { %v326_v25 = vpop.xlane.xlu0 %325 }
 0x2e9   : > { %v330_v26 = vsub.f32 %v321_v18, %v326_v25 }
 0x2eb   : > { %v332_v27 = vmul.f32 1.442695, %v330_v26 }
 0x2ec   : > { %v329_v28 = vpop.xlane.xlu1 %328 }
 0x2ed   : > { %622 = vpow2.f32 %v332_v27  ;;  %v331_v29 = vsub.f32 %v322_v22, %v329_v28 }
 0x2ef   : > { %v334_v30 = vmul.f32 1.442695, %v331_v29 }
 0x2f1   : > { %624 = vpow2.f32 %v334_v30 }
 0x2fa   : > { %v623_v31 = vpop.eup %622 }
 0x2fb   : > { %v336_v32 = vsel %vm323_vm4, %v623_v31, 0.0 }
 0x2fc   : > { %337 = vadd.xlane.f32.xlu1 %v336_v32 }
 0x2fe   : > { %v625_v33 = vpop.eup %624 }
 0x2ff   : > { %v339_v34 = vsel %vm323_vm4, %v625_v33, 0.0 }
 0x300   : > { %340 = vadd.xlane.f32.xlu1 %v339_v34 }
 0x311   : > { %347 = vrot.lane.b32.xlu1 %v262_v9, %s761_s17 }
 0x385   : > { %v338_v35 = vpop.xlane.xlu1 %337 }
 0x386   : > { %626 = vrcp.f32 %v338_v35 }
 0x389   : > { %v341_v36 = vpop.xlane.xlu1 %340 }
 0x38a   : > { %628 = vrcp.f32 %v341_v36 }
 0x38d   : > { %v348_v37 = vpop.permute.xlu1 %347 }
 0x38e   : > { %547 = vmatpush3.bf16.msra.mxu1 %v348_v37 }
 0x393   : > { %v627_v38 = vpop.eup %626 }
 0x394   : > { %v344_v40 = vmul.f32 %v627_v38, %v623_v31 }
 0x397   : > { %v629_v39 = vpop.eup %628 }
 0x398   : > { %v345_v41 = vmul.f32 %v629_v39, %v625_v33 }
 0x39a   : > { %v346_v42 = vpack.c.bf16 %v345_v41, %v344_v40 }
 0x39c   : > { %549 = vmatmul.mubr.msk.bf16.vlgmr.msra.gmra.mxu1 %vm323_vm4, %v346_v42 }
 0x45c   : > { %v387_v43 = vpop.f32.mrf.mxu1 }
 0x45d   : > { %394 = vst.msk [vmem:[%s176_s26] sm:$0xff] %vm266_vm2, %v387_v43 }
 0x45e   : > { %v550_v44 = vpop.f32.mrf.mxu1 }
 0x460   : > { %v390_v45 = vpop.f32.mrf.mxu1 }
 0x461   : > { %395 = vst.msk [vmem:[%s176_s26 + $0x8] sm:$0xff] %vm266_vm2, %v390_v45 }
 0x462   : > { %v551_v46 = vpop.f32.mrf.mxu1 }
 0x463   : > { %697 = shalt.err (!%p694_p0)
}
 0x464   : > { %s698_s6 = scalar_lea.hbm %s932_s27, 256  ;;  %s702_s23 = scalar_lea.hbm %s978_s2, 512 }
 0x465   : > { %p699_p5 = scmp.ne.s32.totalorder %s932_s27, %s698_s6  ;;  %p703_p4 = scmp.lt.s32.totalorder %s932_s27, %s978_s2 }
 0x466   : > { %p704_p6 = scmp.lt.s32.totalorder %s702_s23, %s698_s6 }
 0x467   : > { %p700_p2 = pnand %p699_p5, %p994_p11 }
 0x468   : > { %p705_p8 = por %p704_p6, %p703_p4 }
 0x469   : > { %p701_p1 = pneg %p700_p2 }
 0x46b   : > { %p706_p3 = pnand %p705_p8, %p701_p1 }
 0x46d   : > { %709 = shalt.err (!%p706_p3)
}
 0x46e   : > { %s763_s17 = smov 128   ;;  %s764_s25 = smov 8  }
 0x46f   : > { %558 = dma.vmem_to_hbm [thread:$0]  (%p994_p11), %s927_s8, 256, %s932_s27, %s397_s28, %s763_s17, %s763_s17, %s764_s25  }
 0x470 PF: > { %s425_s26 = sand.u32 1, %s740_s9   ;;  %p995_p7 = scmp.ne.s32.totalorder %s984_s16, 0 }
 0x471   : > { %p996_p9 = scmp.ge.s32.totalorder %s752_s12, 2  ;;  %s426_s18 = scalar_lea.sflag [#allocation4], %s425_s26 }
 0x473   : > { %p569_p10 = pnand %p996_p9, %p995_p7 }
 0x475   : > { %p570_p12 = pneg %p569_p10 }
 0x477   : > { %735 = dma.done.wait (%p570_p12), %s426_s18, 256  }
 0x478   : > { %737 = vsyncadd (%p570_p12), %s426_s18, 4294967040  ;;  %p16_p13 = scmp.ge.s32.totalorder %s834_s21, 4   ;;  %s997_s9 = smov %s744_s10 }
 0x479   : > { %s998_s10 = smov %s748_s11  ;;  %s999_s11 = smov %s854_s29 }
 0x47a   : > { %s1000_s12 = smov %s834_s21  ;;  %18 = sbr.rel (!%p16_p13) target bundleno = 6 (0x6), region = 77 }
 0x47f   :  { %431 = vsyncpa [#allocation3], 1 }
 0x480   :  { %433 = vsyncpa [#allocation3 + $0x1], 1 }
 0x481   :  { %434 = vsyncpa [#allocation6], 1 }
 0x482   :  { %435 = vsyncpa [#allocation4], 1 }
 0x483   :  { %437 = vsyncpa [#allocation4 + $0x1], 1 }

</bundles_post_ra>
